<compile_context>
chip_gen: v6e
topology: v6e:2x2x1
jax: 0.10.0
libtpu: 0.0.40
codegen_flags: <defaults>
</compile_context>

<pallas_src>
import jax
import jax.numpy as jnp
from jax.experimental import pallas as pl
from jax.experimental.pallas import tpu as pltpu

BN_EPS = 1e-5
LANE = 128

_VMEM = pl.BlockSpec(memory_space=pltpu.MemorySpace.VMEM)


# ------------------------------ kernel math ------------------------------- #

def _batchnorm_train(x):
    """BatchNorm1d, training mode, default affine (gamma=1, beta=0)."""
    mean = jnp.mean(x, axis=0, keepdims=True)
    var = jnp.mean((x - mean) ** 2, axis=0, keepdims=True)
    return (x - mean) * jax.lax.rsqrt(var + BN_EPS)


def _dot(a, b):
    return jnp.dot(a, b, preferred_element_type=jnp.float32)


def _actor_math(x, w, b):
    h1 = jnp.maximum(_dot(x, w(0)) + b(0), 0.0)
    h2 = jnp.maximum(_dot(h1, w(1)) + b(1), 0.0)
    return jnp.tanh(_dot(h2, w(2)) + b(2))


def _critic_math(x, actions, mask, w, b):
    h1 = jnp.maximum(_dot(x, w(0)) + b(0), 0.0)
    # torch.cat((h1, actions), dim=1) @ W2.T  ==  h1 @ W2s + actions @ W2a
    h2 = jnp.maximum(_dot(h1, w(1)) + _dot(actions, w(2)) + b(1), 0.0)
    h2 = h2 * mask            # inverted dropout: mask holds 0 or 1/(1-p)
    return _dot(h2, w(3)) + b(2)


# -------------------------------- kernels --------------------------------- #

def actor_kernel(x_ref, w_ref, b_ref, out_ref):
    w = lambda i: w_ref[i * LANE:(i + 1) * LANE, :]
    b = lambda i: b_ref[i:i + 1, :]
    x = _batchnorm_train(x_ref[...])
    out_ref[...] = _actor_math(x, w, b)


def critic_kernel(act_ref, w_ref, b_ref, out_ref):
    w = lambda i: w_ref[i * LANE:(i + 1) * LANE, :]
    b = lambda i: b_ref[i:i + 1, :]
    x = _batchnorm_train(act_ref[:, 0:LANE])
    actions = act_ref[:, LANE:2 * LANE]
    mask = act_ref[:, 2 * LANE:3 * LANE]
    out_ref[...] = _critic_math(x, actions, mask, w, b)


def fused_kernel(act_ref, w_ref, b_ref, out_ref):
    """Actor + Critic in one launch; states BatchNorm computed once."""
    w = lambda i: w_ref[i * LANE:(i + 1) * LANE, :]
    b = lambda i: b_ref[i:i + 1, :]
    x = _batchnorm_train(act_ref[:, 0:LANE])
    actions = act_ref[:, LANE:2 * LANE]
    mask = act_ref[:, 2 * LANE:3 * LANE]
    # Actor: weight-slab blocks 0..2, bias rows 0..2 -> output lanes 0..127.
    out_ref[:, 0:LANE] = _actor_math(x, w, b)
    # Critic: weight-slab blocks 3..6, bias rows 3..5 -> output lanes 128..255.
    out_ref[:, LANE:2 * LANE] = _critic_math(
        x, actions, mask, lambda i: w(3 + i), lambda i: b(3 + i))


# ------------------------------- wrappers ---------------------------------- #

def _pad_cols(x, width):
    return jnp.pad(x, ((0, 0), (0, width - x.shape[1])))


def _dropout_mask(key, shape, p):
    """Inverted-dropout keep mask (0 or 1/(1-p)), training mode."""
    # TODO(synk): on hardware-only paths this could be generated in-kernel
    # with pltpu.prng_seed/prng_random_bits (scalar seed via SMEM); the
    # host-side mask is kept for portability and costs no extra DMA since it
    # rides in the packed activation slab.
    if p <= 0.0:
        return jnp.ones(shape, jnp.float32)
    if p >= 1.0:
        return jnp.zeros(shape, jnp.float32)
    keep = jax.random.bernoulli(key, 1.0 - p, shape)
    return keep.astype(jnp.float32) * (1.0 / (1.0 - p))


def actor_forward(states, params):
    B = states.shape[0]
    xs = _pad_cols(states.astype(jnp.float32), LANE)
    out = pl.pallas_call(
        actor_kernel,
        out_shape=jax.ShapeDtypeStruct((B, LANE), jnp.float32),
        in_specs=[_VMEM, _VMEM, _VMEM],
        out_specs=_VMEM,
    )(xs, params["w"], params["b"])
    return out[:, :params["out_dim"]]


def critic_forward(states, actions, params, *, dropout_p=0.3, dropout_key):
    B = states.shape[0]
    mask = _dropout_mask(dropout_key, (B, LANE), dropout_p)
    act_slab = jnp.concatenate(
        [_pad_cols(states.astype(jnp.float32), LANE),
         _pad_cols(actions.astype(jnp.float32), LANE),
         mask], axis=1)                                    # (B, 384): one DMA
    out = pl.pallas_call(
        critic_kernel,
        out_shape=jax.ShapeDtypeStruct((B, LANE), jnp.float32),
        in_specs=[_VMEM, _VMEM, _VMEM],
        out_specs=_VMEM,
    )(act_slab, params["w"], params["b"])
    return out[:, :params["out_dim"]]


def actor_critic_forward(states, actions, fused_params, *, dropout_p=0.3,
                         dropout_key):
    """Fused Actor + Critic forward: one pallas_call, 3 inputs, 1 output slab."""
    B = states.shape[0]
    mask = _dropout_mask(dropout_key, (B, LANE), dropout_p)
    act_slab = jnp.concatenate(
        [_pad_cols(states.astype(jnp.float32), LANE),
         _pad_cols(actions.astype(jnp.float32), LANE),
         mask], axis=1)
    out = pl.pallas_call(
        fused_kernel,
        out_shape=jax.ShapeDtypeStruct((B, 2 * LANE), jnp.float32),
        in_specs=[_VMEM, _VMEM, _VMEM],
        out_specs=_VMEM,
    )(act_slab, fused_params["w"], fused_params["b"])
    return (out[:, :fused_params["actor_out_dim"]],
            out[:, LANE:LANE + fused_params["critic_out_dim"]])


# ----------------------------- parameter init ------------------------------ #

def _init_linear(key, in_f, out_f, w_lim):
    kw, kb = jax.random.split(key)
    w = jax.random.uniform(kw, (in_f, out_f), jnp.float32, -w_lim, w_lim)
    b_lim = 1.0 / float(in_f) ** 0.5            # torch default bias init
    b = jax.random.uniform(kb, (out_f,), jnp.float32, -b_lim, b_lim)
    return w, b


def _pad_mat(w):
    r, c = w.shape
    return jnp.pad(w, ((0, LANE - r), (0, LANE - c)))


def _bias_row(b):
    return jnp.pad(b, (0, LANE - b.shape[0]))[None, :]


def make_params(key, category_nn, state_size, action_size, hidden_units):
    h0, h1 = hidden_units
    assert max(state_size, action_size, h0, h1) <= LANE, \
        "packing assumes every feature dim fits in one 128-lane block"
    k1, k2, k3 = jax.random.split(key, 3)
    # hidden_init() in the reference uses weight.size()[0] == out_features.
    w1, b1 = _init_linear(k1, state_size, h0, 1.0 / float(h0) ** 0.5)
    if category_nn == "Actor":
        w2, b2 = _init_linear(k2, h0, h1, 1.0 / float(h1) ** 0.5)
        w3, b3 = _init_linear(k3, h1, action_size, 0.003)
        w_slab = jnp.concatenate([_pad_mat(w1), _pad_mat(w2), _pad_mat(w3)], 0)
        b_slab = jnp.concatenate(
            [_bias_row(b1), _bias_row(b2), _bias_row(b3),
             jnp.zeros((5, LANE), jnp.float32)], 0)
        return {"category": "Actor", "w": w_slab, "b": b_slab,
                "out_dim": action_size}
    elif category_nn == "Critic":
        w2, b2 = _init_linear(k2, h0 + action_size, h1, 1.0 / float(h1) ** 0.5)
        w3, b3 = _init_linear(k3, h1, 1, 0.003)
        w2s, w2a = w2[:h0, :], w2[h0:, :]        # concat folding split
        w_slab = jnp.concatenate(
            [_pad_mat(w1), _pad_mat(w2s), _pad_mat(w2a), _pad_mat(w3)], 0)
        b_slab = jnp.concatenate(
            [_bias_row(b1), _bias_row(b2), _bias_row(b3),
             jnp.zeros((5, LANE), jnp.float32)], 0)
        return {"category": "Critic", "w": w_slab, "b": b_slab, "out_dim": 1}
    raise TypeError("Only Actor and Critic Categories are allowed.")


def make_fused_params(actor_params, critic_params):
    """Pack both heads into one (896,128) weight slab + one (8,128) bias slab."""
    w = jnp.concatenate([actor_params["w"], critic_params["w"]], 0)
    b = jnp.concatenate(
        [actor_params["b"][:3], critic_params["b"][:3],
         jnp.zeros((2, LANE), jnp.float32)], 0)
    return {"w": w, "b": b,
            "actor_out_dim": actor_params["out_dim"],
            "critic_out_dim": critic_params["out_dim"]}


# TODO(synk): if this forward runs inside a rollout/training loop with large
# replay batches, add a leading batch-chunk grid axis (weights' index_map
# returning (0,0) so the slabs stay resident) and hoist the BatchNorm
# statistics into a pre-pass so per-tile stats don't change semantics; size
# the batch tile for v7x's 64 MiB VMEM, not a v5e/v6e-sized one.

# ---------------------------------- main ----------------------------------- #

if __name__ == "__main__":
    key = jax.random.PRNGKey(0)
    batch, state_size, action_size = 8, 16, 4
    hidden_units = (32, 32)

    k_s, k_a, k_pa, k_pc, k_do = jax.random.split(key, 5)
    states = jax.random.normal(k_s, (batch, state_size), jnp.float32)
    actions = jax.random.normal(k_a, (batch, action_size), jnp.float32)

    actor_params = make_params(k_pa, "Actor", state_size, action_size,
                               hidden_units)
    critic_params = make_params(k_pc, "Critic", state_size, action_size,
                                hidden_units)
    fused_params = make_fused_params(actor_params, critic_params)

    # Fused (single pallas_call) Actor + Critic forward.
    a_out, q_out = actor_critic_forward(states, actions, fused_params,
                                        dropout_p=0.3, dropout_key=k_do)
    jax.block_until_ready((a_out, q_out))

    # Standalone paths (the module's actual Actor / Critic API).
    a_ref = actor_forward(states, actor_params)
    q_ref = critic_forward(states, actions, critic_params,
                           dropout_p=0.3, dropout_key=k_do)
    jax.block_until_ready((a_ref, q_ref))

    assert a_out.shape == (batch, action_size)
    assert q_out.shape == (batch, 1)
    assert a_ref.shape == (batch, action_size)
    assert q_ref.shape == (batch, 1)
    assert bool(jnp.all(jnp.isfinite(a_out)))
    assert bool(jnp.all(jnp.isfinite(q_out)))
    assert bool(jnp.allclose(a_out, a_ref, atol=1e-5))
    assert bool(jnp.allclose(q_out, q_ref, atol=1e-5))
    print("KERNEL_OK")
</pallas_src>

<mosaic_0001>
module attributes {stable_mosaic.version = 11 : i64} {
  func.func @fused_kernel(%arg0: memref<8x384xf32, #tpu.memory_space<vmem>>, %arg1: memref<896x128xf32, #tpu.memory_space<vmem>>, %arg2: memref<8x128xf32, #tpu.memory_space<vmem>>, %arg3: memref<8x256xf32, #tpu.memory_space<vmem>>) attributes {dimension_semantics = [], scalar_prefetch = 0 : i64, scratch_operands = 0 : i64, tpu.core_type = #tpu.core_type<tc>} {
    %c0 = arith.constant 0 : index
    %c0_0 = arith.constant 0 : index
    %0 = vector.load %arg0[%c0, %c0_0] : memref<8x384xf32, #tpu.memory_space<vmem>>, vector<8x128xf32>
    %cst = arith.constant dense<0.000000e+00> : vector<128xf32>
    %1 = vector.multi_reduction <add>, %0, %cst [0] : vector<8x128xf32> to vector<128xf32>
    %2 = vector.shape_cast %1 : vector<128xf32> to vector<1x128xf32>
    %cst_1 = arith.constant 8.000000e+00 : f32
    %3 = vector.broadcast %cst_1 : f32 to vector<1x128xf32>
    %4 = arith.divf %2, %3 : vector<1x128xf32>
    %5 = vector.broadcast %4 : vector<1x128xf32> to vector<8x128xf32>
    %6 = arith.subf %0, %5 : vector<8x128xf32>
    %7 = arith.mulf %6, %6 : vector<8x128xf32>
    %cst_2 = arith.constant dense<0.000000e+00> : vector<128xf32>
    %8 = vector.multi_reduction <add>, %7, %cst_2 [0] : vector<8x128xf32> to vector<128xf32>
    %9 = vector.shape_cast %8 : vector<128xf32> to vector<1x128xf32>
    %cst_3 = arith.constant 8.000000e+00 : f32
    %10 = vector.broadcast %cst_3 : f32 to vector<1x128xf32>
    %11 = arith.divf %9, %10 : vector<1x128xf32>
    %12 = vector.broadcast %4 : vector<1x128xf32> to vector<8x128xf32>
    %13 = arith.subf %0, %12 : vector<8x128xf32>
    %cst_4 = arith.constant 9.99999974E-6 : f32
    %14 = vector.broadcast %cst_4 : f32 to vector<1x128xf32>
    %15 = arith.addf %11, %14 : vector<1x128xf32>
    %16 = math.rsqrt %15 : vector<1x128xf32>
    %17 = vector.broadcast %16 : vector<1x128xf32> to vector<8x128xf32>
    %18 = arith.mulf %13, %17 : vector<8x128xf32>
    %c0_5 = arith.constant 0 : index
    %c128 = arith.constant 128 : index
    %19 = vector.load %arg0[%c0_5, %c128] : memref<8x384xf32, #tpu.memory_space<vmem>>, vector<8x128xf32>
    %c0_6 = arith.constant 0 : index
    %c256 = arith.constant 256 : index
    %20 = vector.load %arg0[%c0_6, %c256] : memref<8x384xf32, #tpu.memory_space<vmem>>, vector<8x128xf32>
    %c0_7 = arith.constant 0 : index
    %c0_8 = arith.constant 0 : index
    %21 = vector.load %arg1[%c0_7, %c0_8] : memref<896x128xf32, #tpu.memory_space<vmem>>, vector<128x128xf32>
    %cst_9 = arith.constant dense<0.000000e+00> : vector<8x128xf32>
    %22 = tpu.matmul %18, %21, %cst_9 {dimension_numbers = #tpu.dot_dimension_numbers<[1], [0], [0], [1], [0, 0, 1, 1], [], []>} : vector<8x128xf32>, vector<128x128xf32>, vector<8x128xf32> -> vector<8x128xf32>
    %c0_10 = arith.constant 0 : index
    %c0_11 = arith.constant 0 : index
    %23 = vector.load %arg2[%c0_10, %c0_11] : memref<8x128xf32, #tpu.memory_space<vmem>>, vector<1x128xf32>
    %24 = vector.broadcast %23 : vector<1x128xf32> to vector<8x128xf32>
    %25 = arith.addf %22, %24 : vector<8x128xf32>
    %cst_12 = arith.constant 0.000000e+00 : f32
    %26 = vector.broadcast %cst_12 : f32 to vector<8x128xf32>
    %27 = arith.maximumf %25, %26 : vector<8x128xf32>
    %c128_13 = arith.constant 128 : index
    %c0_14 = arith.constant 0 : index
    %28 = vector.load %arg1[%c128_13, %c0_14] : memref<896x128xf32, #tpu.memory_space<vmem>>, vector<128x128xf32>
    %cst_15 = arith.constant dense<0.000000e+00> : vector<8x128xf32>
    %29 = tpu.matmul %27, %28, %cst_15 {dimension_numbers = #tpu.dot_dimension_numbers<[1], [0], [0], [1], [0, 0, 1, 1], [], []>} : vector<8x128xf32>, vector<128x128xf32>, vector<8x128xf32> -> vector<8x128xf32>
    %c1 = arith.constant 1 : index
    %c0_16 = arith.constant 0 : index
    %30 = vector.load %arg2[%c1, %c0_16] : memref<8x128xf32, #tpu.memory_space<vmem>>, vector<1x128xf32>
    %31 = vector.broadcast %30 : vector<1x128xf32> to vector<8x128xf32>
    %32 = arith.addf %29, %31 : vector<8x128xf32>
    %cst_17 = arith.constant 0.000000e+00 : f32
    %33 = vector.broadcast %cst_17 : f32 to vector<8x128xf32>
    %34 = arith.maximumf %32, %33 : vector<8x128xf32>
    %c256_18 = arith.constant 256 : index
    %c0_19 = arith.constant 0 : index
    %35 = vector.load %arg1[%c256_18, %c0_19] : memref<896x128xf32, #tpu.memory_space<vmem>>, vector<128x128xf32>
    %cst_20 = arith.constant dense<0.000000e+00> : vector<8x128xf32>
    %36 = tpu.matmul %34, %35, %cst_20 {dimension_numbers = #tpu.dot_dimension_numbers<[1], [0], [0], [1], [0, 0, 1, 1], [], []>} : vector<8x128xf32>, vector<128x128xf32>, vector<8x128xf32> -> vector<8x128xf32>
    %c2 = arith.constant 2 : index
    %c0_21 = arith.constant 0 : index
    %37 = vector.load %arg2[%c2, %c0_21] : memref<8x128xf32, #tpu.memory_space<vmem>>, vector<1x128xf32>
    %38 = vector.broadcast %37 : vector<1x128xf32> to vector<8x128xf32>
    %39 = arith.addf %36, %38 : vector<8x128xf32>
    %40 = math.tanh %39 : vector<8x128xf32>
    %c0_22 = arith.constant 0 : index
    %c0_23 = arith.constant 0 : index
    %41 = vector.load %arg3[%c0_22, %c0_23] : memref<8x256xf32, #tpu.memory_space<vmem>>, vector<8x128xf32>
    tpu.vector_store %arg3[%c0_22, %c0_23], %40 {strides = array<i32>} : memref<8x256xf32, #tpu.memory_space<vmem>>, vector<8x128xf32>,
    %c384 = arith.constant 384 : index
    %c0_24 = arith.constant 0 : index
    %42 = vector.load %arg1[%c384, %c0_24] : memref<896x128xf32, #tpu.memory_space<vmem>>, vector<128x128xf32>
    %cst_25 = arith.constant dense<0.000000e+00> : vector<8x128xf32>
    %43 = tpu.matmul %18, %42, %cst_25 {dimension_numbers = #tpu.dot_dimension_numbers<[1], [0], [0], [1], [0, 0, 1, 1], [], []>} : vector<8x128xf32>, vector<128x128xf32>, vector<8x128xf32> -> vector<8x128xf32>
    %c3 = arith.constant 3 : index
    %c0_26 = arith.constant 0 : index
    %44 = vector.load %arg2[%c3, %c0_26] : memref<8x128xf32, #tpu.memory_space<vmem>>, vector<1x128xf32>
    %45 = vector.broadcast %44 : vector<1x128xf32> to vector<8x128xf32>
    %46 = arith.addf %43, %45 : vector<8x128xf32>
    %cst_27 = arith.constant 0.000000e+00 : f32
    %47 = vector.broadcast %cst_27 : f32 to vector<8x128xf32>
    %48 = arith.maximumf %46, %47 : vector<8x128xf32>
    %c512 = arith.constant 512 : index
    %c0_28 = arith.constant 0 : index
    %49 = vector.load %arg1[%c512, %c0_28] : memref<896x128xf32, #tpu.memory_space<vmem>>, vector<128x128xf32>
    %cst_29 = arith.constant dense<0.000000e+00> : vector<8x128xf32>
    %50 = tpu.matmul %48, %49, %cst_29 {dimension_numbers = #tpu.dot_dimension_numbers<[1], [0], [0], [1], [0, 0, 1, 1], [], []>} : vector<8x128xf32>, vector<128x128xf32>, vector<8x128xf32> -> vector<8x128xf32>
    %c640 = arith.constant 640 : index
    %c0_30 = arith.constant 0 : index
    %51 = vector.load %arg1[%c640, %c0_30] : memref<896x128xf32, #tpu.memory_space<vmem>>, vector<128x128xf32>
    %cst_31 = arith.constant dense<0.000000e+00> : vector<8x128xf32>
    %52 = tpu.matmul %19, %51, %cst_31 {dimension_numbers = #tpu.dot_dimension_numbers<[1], [0], [0], [1], [0, 0, 1, 1], [], []>} : vector<8x128xf32>, vector<128x128xf32>, vector<8x128xf32> -> vector<8x128xf32>
    %53 = arith.addf %50, %52 : vector<8x128xf32>
    %c4 = arith.constant 4 : index
    %c0_32 = arith.constant 0 : index
    %54 = vector.load %arg2[%c4, %c0_32] : memref<8x128xf32, #tpu.memory_space<vmem>>, vector<1x128xf32>
    %55 = vector.broadcast %54 : vector<1x128xf32> to vector<8x128xf32>
    %56 = arith.addf %53, %55 : vector<8x128xf32>
    %cst_33 = arith.constant 0.000000e+00 : f32
    %57 = vector.broadcast %cst_33 : f32 to vector<8x128xf32>
    %58 = arith.maximumf %56, %57 : vector<8x128xf32>
    %59 = arith.mulf %58, %20 : vector<8x128xf32>
    %c768 = arith.constant 768 : index
    %c0_34 = arith.constant 0 : index
    %60 = vector.load %arg1[%c768, %c0_34] : memref<896x128xf32, #tpu.memory_space<vmem>>, vector<128x128xf32>
    %cst_35 = arith.constant dense<0.000000e+00> : vector<8x128xf32>
    %61 = tpu.matmul %59, %60, %cst_35 {dimension_numbers = #tpu.dot_dimension_numbers<[1], [0], [0], [1], [0, 0, 1, 1], [], []>} : vector<8x128xf32>, vector<128x128xf32>, vector<8x128xf32> -> vector<8x128xf32>
    %c5 = arith.constant 5 : index
    %c0_36 = arith.constant 0 : index
    %62 = vector.load %arg2[%c5, %c0_36] : memref<8x128xf32, #tpu.memory_space<vmem>>, vector<1x128xf32>
    %63 = vector.broadcast %62 : vector<1x128xf32> to vector<8x128xf32>
    %64 = arith.addf %61, %63 : vector<8x128xf32>
    %c0_37 = arith.constant 0 : index
    %c128_38 = arith.constant 128 : index
    %65 = vector.load %arg3[%c0_37, %c128_38] : memref<8x256xf32, #tpu.memory_space<vmem>>, vector<8x128xf32>
    tpu.vector_store %arg3[%c0_37, %c128_38], %64 {strides = array<i32>} : memref<8x256xf32, #tpu.memory_space<vmem>>, vector<8x128xf32>,
    return
  }
}

</mosaic_0001>

<bundles_post_ra>
// kernel: tpu_custom_call.1
= control target key start
LH: loop header
LB: loop body
LE: loop exit
PB: predicated region body
PF: predicated region fallthrough
CT: control target
= control target key end

     0   :  { %8 = vsyncpa [#allocation3], 0  ;;  %s1370_s0 = inlined_call_operand.hbm [shape: f32[8,384], index: 0, kind: input, shape index: {}]   ;;  %s1371_s1 = inlined_call_operand.hbm [shape: f32[896,128], index: 1, kind: input, shape index: {}]   ;;  %s1372_s2 = inlined_call_operand.hbm [shape: f32[8,128], index: 2, kind: input, shape index: {}]   ;;  %s1373_s3 = inlined_call_operand.hbm [shape: f32[8,256], index: 3, kind: output, shape index: {}]  }
   0x1   :  { %9 = vsyncpa [#allocation6], 0 }
   0x2   :  { %10 = vsyncpa [#allocation4], 0  ;;  %s1200_s12 = smov [#allocation5]  }
   0x3   :  { %s26_s13 = sshll.u32 %s1200_s12, 4  ;;  %s27_s13 = int_to_ptr.vmem [resolvable:$true] %s26_s13 }
   0x4   :  { %s1122_s14 = scalar_lea.vmem %s27_s13, 14336  ;;  %p1127_p1 = scmp.lt.s32.totalorder %s27_s13, %s27_s13 }
   0x5   :  { %p1123_p0 = scmp.ne.s32.totalorder %s27_s13, %s1122_s14  ;;  %p1128_p2 = scmp.lt.s32.totalorder %s1122_s14, %s1122_s14 }
   0x7   :  { %p1129_p3 = por %p1128_p2, %p1127_p1 }
   0x9   :  { %p1130_p4 = pnand %p1129_p3, %p1123_p0 }
   0xb   :  { %1133 = shalt.err (!%p1130_p4)
}
   0xc   :  { %s1201_s15 = smov 128   ;;  %s1202_s16 = smov 8  }
   0xd   :  { %32 = dma.hbm_to_vmem [thread:$0]  %s1371_s1, 14336, %s27_s13, [#allocation6], %s1201_s15, %s1201_s15, %s1202_s16  }
   0xe   :  { %s1203_s19 = smov [#allocation2]   ;;  %s1204_s21 = smov [#allocation7]  }
   0xf   :  { %s17_s20 = sshll.u32 %s1203_s19, 4  ;;  %s39_s22 = sshll.u32 %s1204_s21, 4  ;;  %s18_s20 = int_to_ptr.vmem [resolvable:$true] %s17_s20  ;;  %s40_s22 = int_to_ptr.vmem [resolvable:$true] %s39_s22 }
  0x10   :  { %s1142_s23 = scalar_lea.vmem %s18_s20, 384  ;;  %p1147_p6 = scmp.lt.s32.totalorder %s18_s20, %s18_s20 }
  0x11   :  { %p1143_p5 = scmp.ne.s32.totalorder %s18_s20, %s1142_s23  ;;  %p1148_p7 = scmp.lt.s32.totalorder %s1142_s23, %s1142_s23 }
  0x13   :  { %p1149_p8 = por %p1148_p7, %p1147_p6 }
  0x15   :  { %p1150_p9 = pnand %p1149_p8, %p1143_p5 }
  0x17   :  { %1153 = shalt.err (!%p1150_p9)
}
  0x18   :  { %20 = dma.hbm_to_vmem [thread:$0]  %s1370_s0, 384, %s18_s20, [#allocation3]  }
  0x19   :  { %s1162_s26 = scalar_lea.vmem %s40_s22, 128  ;;  %p1167_p11 = scmp.lt.s32.totalorder %s40_s22, %s40_s22 }
  0x1a   :  { %p1163_p10 = scmp.ne.s32.totalorder %s40_s22, %s1162_s26  ;;  %p1168_p12 = scmp.lt.s32.totalorder %s1162_s26, %s1162_s26 }
  0x1c   :  { %p1169_p13 = por %p1168_p12, %p1167_p11 }
  0x1e   :  { %p1170_p0 = pnand %p1169_p13, %p1163_p10 }
  0x20   :  { %1173 = shalt.err (!%p1170_p0)
}
  0x21   :  { %42 = dma.hbm_to_vmem [thread:$0]  %s1372_s2, 128, %s40_s22, [#allocation6]  }
  0x22   :  { %1194 = dma.done.wait [#allocation3], 384  }
  0x23   :  { %1195 = vsyncadd [#allocation3], 4294966912 }
  0x24   :  { %1196 = dma.done.wait [#allocation6], 14464  }
  0x25   :  { %1197 = vsyncadd [#allocation6], 4294952832  ;;  %v1205_v0 = vmov 0.0   ;;  %vm1206_vm0 = vmmov 0   ;;  %v90_v1 = vld [vmem:[#allocation5 + $0x78] sm:$0xff]  ;;  %v89_v2 = vld [vmem:[#allocation5 + $0x70] sm:$0xff] }
  0x26   :  { %857 = vmatprep.subr.mxu0 %v1205_v0  ;;  %889 = vmatprep.mubr.msk.f32.mxu0 %vm1206_vm0, %v1205_v0  ;;  %v88_v3 = vld [vmem:[#allocation5 + $0x68] sm:$0xff]  ;;  %v87_v4 = vld [vmem:[#allocation5 + $0x60] sm:$0xff]  ;;  %v182_v6 = vld [vmem:[#allocation5 + $0xf8] sm:$0xff]  ;;  %s1207_s0 = smov [#allocation8]  }
  0x27   :  { %892 = vmatprep.subr.mxu1 %v1205_v0  ;;  %924 = vmatprep.mubr.msk.f32.mxu1 %vm1206_vm0, %v1205_v0  ;;  %v52_v5 = vld [vmem:[#allocation2] sm:$0xff]  ;;  %v86_v7 = vld [vmem:[#allocation5 + $0x58] sm:$0xff]  ;;  %v181_v9 = vld [vmem:[#allocation5 + $0xf0] sm:$0xff]  ;;  %s722_s2 = sshll.u32 %s1207_s0, 4  ;;  %s723_s2 = int_to_ptr.vmem [resolvable:$true] %s722_s2 }
  0x28   :  { %858 = vmatpush3.msra.mxu0 %v90_v1  ;;  %v53_v8 = vrot.slane %v52_v5, 4  ;;  %893 = vmatpush3.msra.mxu1 %v182_v6  ;;  %v180_v10 = vld [vmem:[#allocation5 + $0xe8] sm:$0xff]  ;;  %v85_v11 = vld [vmem:[#allocation5 + $0x50] sm:$0xff]  ;;  %v179_v13 = vld [vmem:[#allocation5 + $0xe0] sm:$0xff]  ;;  %s1174_s28 = scalar_lea.vmem %s723_s2, 256  ;;  %p1179_p2 = scmp.lt.s32.totalorder %s723_s2, %s723_s2 }
  0x29   :  { %859 = vmatprep.subr.mxu0 %v1205_v0  ;;  %894 = vmatprep.subr.mxu1 %v1205_v0  ;;  %v84_v14 = vld [vmem:[#allocation5 + $0x48] sm:$0xff]  ;;  %v178_v16 = vld [vmem:[#allocation5 + $0xd8] sm:$0xff]  ;;  %v83_v17 = vld [vmem:[#allocation5 + $0x40] sm:$0xff]  ;;  %p1175_p1 = scmp.ne.s32.totalorder %s723_s2, %s1174_s28  ;;  %p1180_p3 = scmp.lt.s32.totalorder %s1174_s28, %s1174_s28 }
  0x2a   :  { %860 = vmatpush3.msra.mxu0 %v89_v2  ;;  %v54_v12 = vadd.f32 %v53_v8, %v52_v5  ;;  %895 = vmatpush3.msra.mxu1 %v181_v9  ;;  %v177_v19 = vld [vmem:[#allocation5 + $0xd0] sm:$0xff]  ;;  %v82_v20 = vld [vmem:[#allocation5 + $0x38] sm:$0xff]  ;;  %v176_v22 = vld [vmem:[#allocation5 + $0xc8] sm:$0xff] }
  0x2b   :  { %861 = vmatprep.subr.mxu0 %v1205_v0  ;;  %896 = vmatprep.subr.mxu1 %v1205_v0  ;;  %v81_v23 = vld [vmem:[#allocation5 + $0x30] sm:$0xff]  ;;  %v175_v25 = vld [vmem:[#allocation5 + $0xc0] sm:$0xff]  ;;  %v80_v26 = vld [vmem:[#allocation5 + $0x28] sm:$0xff]  ;;  %p1181_p4 = por %p1180_p3, %p1179_p2 }
  0x2c   :  { %862 = vmatpush3.msra.mxu0 %v88_v3  ;;  %v55_v15 = vrot.slane %v54_v12, 2  ;;  %897 = vmatpush3.msra.mxu1 %v180_v10  ;;  %v174_v28 = vld [vmem:[#allocation5 + $0xb8] sm:$0xff]  ;;  %v79_v29 = vld [vmem:[#allocation5 + $0x20] sm:$0xff]  ;;  %v173_v31 = vld [vmem:[#allocation5 + $0xb0] sm:$0xff] }
  0x2d   :  { %863 = vmatprep.subr.mxu0 %v1205_v0  ;;  %898 = vmatprep.subr.mxu1 %v1205_v0  ;;  %v78_v32 = vld [vmem:[#allocation5 + $0x18] sm:$0xff]  ;;  %v172_v34 = vld [vmem:[#allocation5 + $0xa8] sm:$0xff]  ;;  %v77_v35 = vld [vmem:[#allocation5 + $0x10] sm:$0xff]  ;;  %p1182_p5 = pnand %p1181_p4, %p1175_p1 }
  0x2e   :  { %864 = vmatpush3.msra.mxu0 %v87_v4  ;;  %v56_v18 = vadd.f32 %v55_v15, %v54_v12  ;;  %899 = vmatpush3.msra.mxu1 %v179_v13  ;;  %v171_v37 = vld [vmem:[#allocation5 + $0xa0] sm:$0xff]  ;;  %v76_v38 = vld [vmem:[#allocation5 + $0x8] sm:$0xff]  ;;  %v170_v40 = vld [vmem:[#allocation5 + $0x98] sm:$0xff] }
  0x2f   :  { %865 = vmatprep.subr.mxu0 %v1205_v0  ;;  %900 = vmatprep.subr.mxu1 %v1205_v0  ;;  %v75_v41 = vld [vmem:[#allocation5] sm:$0xff]  ;;  %v169_v43 = vld [vmem:[#allocation5 + $0x90] sm:$0xff]  ;;  %v168_v51 = vld [vmem:[#allocation5 + $0x88] sm:$0xff] }
  0x30   :  { %866 = vmatpush3.msra.mxu0 %v86_v7  ;;  %v57_v21 = vrot.slane %v56_v18, 1  ;;  %901 = vmatpush3.msra.mxu1 %v178_v16  ;;  %v167_v52 = vld [vmem:[#allocation5 + $0x80] sm:$0xff]  ;;  %v274_v53 = vld [vmem:[#allocation5 + $0x178] sm:$0xff]  ;;  %v273_v54 = vld [vmem:[#allocation5 + $0x170] sm:$0xff] }
  0x31   :  { %867 = vmatprep.subr.mxu0 %v1205_v0  ;;  %902 = vmatprep.subr.mxu1 %v1205_v0  ;;  %v272_v55 = vld [vmem:[#allocation5 + $0x168] sm:$0xff]  ;;  %v271_v56 = vld [vmem:[#allocation5 + $0x160] sm:$0xff]  ;;  %v270_v57 = vld [vmem:[#allocation5 + $0x158] sm:$0xff] }
  0x32   :  { %868 = vmatpush3.msra.mxu0 %v85_v11  ;;  %v58_v24 = vadd.f32 %v57_v21, %v56_v18  ;;  %903 = vmatpush3.msra.mxu1 %v177_v19  ;;  %v269_v58 = vld [vmem:[#allocation5 + $0x150] sm:$0xff]  ;;  %v268_v59 = vld [vmem:[#allocation5 + $0x148] sm:$0xff]  ;;  %v267_v60 = vld [vmem:[#allocation5 + $0x140] sm:$0xff] }
  0x33   :  { %869 = vmatprep.subr.mxu0 %v1205_v0  ;;  %904 = vmatprep.subr.mxu1 %v1205_v0  ;;  %v266_v61 = vld [vmem:[#allocation5 + $0x138] sm:$0xff]  ;;  %v265_v62 = vld [vmem:[#allocation5 + $0x130] sm:$0xff]  ;;  %v264_v63 = vld [vmem:[#allocation5 + $0x128] sm:$0xff] }
  0x34   :  { %870 = vmatpush3.msra.mxu0 %v84_v14  ;;  %v60_v27 = vmul.f32 0.125, %v58_v24  ;;  %905 = vmatpush3.msra.mxu1 %v176_v22  ;;  %v263_v1 = vld [vmem:[#allocation5 + $0x120] sm:$0xff]  ;;  %v262_v2 = vld [vmem:[#allocation5 + $0x118] sm:$0xff]  ;;  %v261_v3 = vld [vmem:[#allocation5 + $0x110] sm:$0xff] }
  0x35   :  { %871 = vmatprep.subr.mxu0 %v1205_v0  ;;  %906 = vmatprep.subr.mxu1 %v1205_v0  ;;  %v732_v4 = vld [vmem:[#allocation7] ss:$0 sm:$0xff]  ;;  %v367_v9 = vld [vmem:[#allocation5 + $0x1f8] sm:$0xff]  ;;  %v366_v10 = vld [vmem:[#allocation5 + $0x1f0] sm:$0xff] }
  0x36   :  { %872 = vmatpush3.msra.mxu0 %v83_v17  ;;  %v61_v30 = vsub.f32 %v52_v5, %v60_v27  ;;  %907 = vmatpush3.msra.mxu1 %v175_v25  ;;  %v365_v11 = vld [vmem:[#allocation5 + $0x1e8] sm:$0xff]  ;;  %v364_v12 = vld [vmem:[#allocation5 + $0x1e0] sm:$0xff]  ;;  %v363_v13 = vld [vmem:[#allocation5 + $0x1d8] sm:$0xff] }
  0x37   :  { %873 = vmatprep.subr.mxu0 %v1205_v0  ;;  %908 = vmatprep.subr.mxu1 %v1205_v0  ;;  %v362_v14 = vld [vmem:[#allocation5 + $0x1d0] sm:$0xff]  ;;  %v361_v15 = vld [vmem:[#allocation5 + $0x1c8] sm:$0xff]  ;;  %v360_v16 = vld [vmem:[#allocation5 + $0x1c0] sm:$0xff] }
  0x38   :  { %874 = vmatpush3.msra.mxu0 %v82_v20  ;;  %v62_v33 = vmul.f32 %v61_v30, %v61_v30  ;;  %909 = vmatpush3.msra.mxu1 %v174_v28  ;;  %v359_v17 = vld [vmem:[#allocation5 + $0x1b8] sm:$0xff]  ;;  %v358_v18 = vld [vmem:[#allocation5 + $0x1b0] sm:$0xff]  ;;  %v357_v19 = vld [vmem:[#allocation5 + $0x1a8] sm:$0xff] }
  0x39   :  { %875 = vmatprep.subr.mxu0 %v1205_v0  ;;  %910 = vmatprep.subr.mxu1 %v1205_v0  ;;  %v356_v20 = vld [vmem:[#allocation5 + $0x1a0] sm:$0xff]  ;;  %v355_v21 = vld [vmem:[#allocation5 + $0x198] sm:$0xff]  ;;  %v354_v22 = vld [vmem:[#allocation5 + $0x190] sm:$0xff] }
  0x3a   :  { %876 = vmatpush3.msra.mxu0 %v81_v23  ;;  %v63_v36 = vrot.slane %v62_v33, 4  ;;  %911 = vmatpush3.msra.mxu1 %v173_v31  ;;  %v353_v23 = vld [vmem:[#allocation5 + $0x188] sm:$0xff]  ;;  %v352_v24 = vld [vmem:[#allocation5 + $0x180] sm:$0xff]  ;;  %v459_v27 = vld [vmem:[#allocation5 + $0x278] sm:$0xff] }
  0x3b   :  { %877 = vmatprep.subr.mxu0 %v1205_v0  ;;  %912 = vmatprep.subr.mxu1 %v1205_v0  ;;  %v260_v25 = vld [vmem:[#allocation5 + $0x108] sm:$0xff]  ;;  %v458_v28 = vld [vmem:[#allocation5 + $0x270] sm:$0xff]  ;;  %v455_v31 = vld [vmem:[#allocation5 + $0x258] sm:$0xff] }
  0x3c   :  { %878 = vmatpush3.msra.mxu0 %v80_v26  ;;  %v64_v39 = vadd.f32 %v63_v36, %v62_v33  ;;  %913 = vmatpush3.msra.mxu1 %v172_v34  ;;  %v259_v26 = vld [vmem:[#allocation5 + $0x100] sm:$0xff]  ;;  %v453_v33 = vld [vmem:[#allocation5 + $0x248] sm:$0xff]  ;;  %v450_v36 = vld [vmem:[#allocation5 + $0x230] sm:$0xff] }
  0x3d   :  { %879 = vmatprep.subr.mxu0 %v1205_v0  ;;  %914 = vmatprep.subr.mxu1 %v1205_v0  ;;  %v452_v34 = vld [vmem:[#allocation5 + $0x240] sm:$0xff] }
  0x3e   :  { %880 = vmatpush3.msra.mxu0 %v79_v29  ;;  %v65_v42 = vrot.slane %v64_v39, 2  ;;  %915 = vmatpush3.msra.mxu1 %v171_v37  ;;  %v457_v29 = vld [vmem:[#allocation5 + $0x268] sm:$0xff] }
  0x3f   :  { %881 = vmatprep.subr.mxu0 %v1205_v0  ;;  %916 = vmatprep.subr.mxu1 %v1205_v0  ;;  %v449_v37 = vld [vmem:[#allocation5 + $0x228] sm:$0xff] }
  0x40   :  { %882 = vmatpush3.msra.mxu0 %v78_v32  ;;  %v66_v44 = vadd.f32 %v65_v42, %v64_v39  ;;  %917 = vmatpush3.msra.mxu1 %v170_v40  ;;  %v454_v32 = vld [vmem:[#allocation5 + $0x250] sm:$0xff]  ;;  %v447_v39 = vld [vmem:[#allocation5 + $0x218] sm:$0xff]  ;;  %v444_v42 = vld [vmem:[#allocation5 + $0x200] sm:$0xff] }
  0x41   :  { %883 = vmatprep.subr.mxu0 %v1205_v0  ;;  %918 = vmatprep.subr.mxu1 %v1205_v0  ;;  %v446_v40 = vld [vmem:[#allocation5 + $0x210] sm:$0xff] }
  0x42   :  { %884 = vmatpush3.msra.mxu0 %v77_v35  ;;  %v67_v45 = vrot.slane %v66_v44, 1  ;;  %919 = vmatpush3.msra.mxu1 %v169_v43  ;;  %v451_v35 = vld [vmem:[#allocation5 + $0x238] sm:$0xff]  ;;  %v733_v43 = vld [vmem:[#allocation7 + $0x1] ss:$0 sm:$0xff] }
  0x43   :  { %885 = vmatprep.subr.mxu0 %v1205_v0  ;;  %920 = vmatprep.subr.mxu1 %v1205_v0 }
  0x44   :  { %886 = vmatpush3.msra.mxu0 %v76_v38  ;;  %v68_v46 = vadd.f32 %v67_v45, %v66_v44  ;;  %921 = vmatpush3.msra.mxu1 %v168_v51  ;;  %v448_v38 = vld [vmem:[#allocation5 + $0x220] sm:$0xff] }
  0x45   :  { %887 = vmatprep.subr.mxu0 %v1205_v0  ;;  %922 = vmatprep.subr.mxu1 %v1205_v0  ;;  %v472_v51 = vld [vmem:[#allocation5 + $0x2e0] sm:$0xff] }
  0x46   :  { %888 = vmatpush3.msra.mxu0 %v75_v41  ;;  %v69_v47 = vmul.f32 0.125, %v68_v46  ;;  %923 = vmatpush3.msra.mxu1 %v167_v52  ;;  %v445_v41 = vld [vmem:[#allocation5 + $0x208] sm:$0xff]  ;;  %v471_v52 = vld [vmem:[#allocation5 + $0x2d8] sm:$0xff] }
  0x47   :  { %927 = vmatprep.subr.mxu0 %v1205_v0  ;;  %962 = vmatprep.subr.mxu1 %v1205_v0 }
  0x48   :  { %v70_v48 = vadd.f32 1e-05, %v69_v47 }
  0x4a   :  { %1110 = vrsqrt.f32 %v70_v48  ;;  %v475_v48 = vld [vmem:[#allocation5 + $0x2f8] sm:$0xff] }
  0x57   :  { %v1111_v49 = vpop.eup %1110 }
  0x58   :  { %v1273_v50 = vmul.f32 %v1111_v49, %v61_v30  ;;  %v456_v30 = vld [vmem:[#allocation5 + $0x260] sm:$0xff]  ;;  %v474_v49 = vld [vmem:[#allocation5 + $0x2f0] sm:$0xff] }
  0x5a   :  { %890 = vmatmul.mubr.f32.vlgmr.msra.gmra.mxu0 %v1273_v50 }
  0x5b   :  { %959 = vmatprep.mubr.msk.f32.mxu0 %vm1206_vm0, %v1205_v0  ;;  %928 = vmatpush3.msra.mxu0 %v274_v53  ;;  %v470_v53 = vld [vmem:[#allocation5 + $0x2d0] sm:$0xff] }
  0x5c   :  { %929 = vmatprep.subr.mxu0 %v1205_v0 }
  0x5d   :  { %930 = vmatpush3.msra.mxu0 %v273_v54  ;;  %v469_v54 = vld [vmem:[#allocation5 + $0x2c8] sm:$0xff] }
  0x5e   :  { %931 = vmatprep.subr.mxu0 %v1205_v0 }
  0x5f   :  { %932 = vmatpush3.msra.mxu0 %v272_v55  ;;  %v468_v55 = vld [vmem:[#allocation5 + $0x2c0] sm:$0xff] }
  0x60   :  { %933 = vmatprep.subr.mxu0 %v1205_v0 }
  0x61   :  { %934 = vmatpush3.msra.mxu0 %v271_v56  ;;  %v467_v56 = vld [vmem:[#allocation5 + $0x2b8] sm:$0xff] }
  0x62   :  { %935 = vmatprep.subr.mxu0 %v1205_v0 }
  0x63   :  { %936 = vmatpush3.msra.mxu0 %v270_v57  ;;  %v466_v57 = vld [vmem:[#allocation5 + $0x2b0] sm:$0xff] }
  0x64   :  { %937 = vmatprep.subr.mxu0 %v1205_v0 }
  0x65   :  { %938 = vmatpush3.msra.mxu0 %v269_v58  ;;  %v465_v58 = vld [vmem:[#allocation5 + $0x2a8] sm:$0xff] }
  0x66   :  { %939 = vmatprep.subr.mxu0 %v1205_v0 }
  0x67   :  { %940 = vmatpush3.msra.mxu0 %v268_v59  ;;  %v464_v59 = vld [vmem:[#allocation5 + $0x2a0] sm:$0xff] }
  0x68   :  { %941 = vmatprep.subr.mxu0 %v1205_v0 }
  0x69   :  { %942 = vmatpush3.msra.mxu0 %v267_v60  ;;  %v463_v60 = vld [vmem:[#allocation5 + $0x298] sm:$0xff] }
  0x6a   :  { %943 = vmatprep.subr.mxu0 %v1205_v0 }
  0x6b   :  { %944 = vmatpush3.msra.mxu0 %v266_v61  ;;  %v462_v61 = vld [vmem:[#allocation5 + $0x290] sm:$0xff] }
  0x6c   :  { %945 = vmatprep.subr.mxu0 %v1205_v0 }
  0x6d   :  { %946 = vmatpush3.msra.mxu0 %v265_v62  ;;  %v735_v62 = vld [vmem:[#allocation7 + $0x3] ss:$0 sm:$0xff] }
  0x6e   :  { %947 = vmatprep.subr.mxu0 %v1205_v0 }
  0x6f   :  { %948 = vmatpush3.msra.mxu0 %v264_v63  ;;  %v461_v63 = vld [vmem:[#allocation5 + $0x288] sm:$0xff] }
  0x70   :  { %949 = vmatprep.subr.mxu0 %v1205_v0 }
  0x71   :  { %950 = vmatpush3.msra.mxu0 %v263_v1 }
  0x72   :  { %951 = vmatprep.subr.mxu0 %v1205_v0 }
  0x73   :  { %952 = vmatpush3.msra.mxu0 %v262_v2 }
  0x74   :  { %953 = vmatprep.subr.mxu0 %v1205_v0 }
  0x75   :  { %954 = vmatpush3.msra.mxu0 %v261_v3  ;;  %v460_v3 = vld [vmem:[#allocation5 + $0x280] sm:$0xff] }
  0x76   :  { %955 = vmatprep.subr.mxu0 %v1205_v0 }
  0x77   :  { %956 = vmatpush3.msra.mxu0 %v260_v25 }
  0x78   :  { %957 = vmatprep.subr.mxu0 %v1205_v0 }
  0x79   :  { %958 = vmatpush3.msra.mxu0 %v259_v26 }
  0x7a   :  { %997 = vmatprep.subr.mxu0 %v1205_v0 }
 0x11a   :  { %v162_v5 = vpop.f32.mrf.mxu0 }
 0x11b   :  { %v163_v6 = vadd.f32 %v732_v4, %v162_v5  ;;  %v73_v5 = vld [vmem:[#allocation2 + $0x8] sm:$0xff] }
 0x11c   :  { %v891_v7 = vpop.f32.mrf.mxu0 }
 0x11d   :  { %v166_v8 = vmax.f32 %v163_v6, 0.0  ;;  %v639_v7 = vld [vmem:[#allocation5 + $0x378] sm:$0xff] }
 0x11f   :  { %925 = vmatmul.mubr.f32.vlgmr.msra.gmra.mxu1 %v166_v8  ;;  %v638_v8 = vld [vmem:[#allocation5 + $0x370] sm:$0xff] }
 0x120   :  { %963 = vmatpush3.msra.mxu1 %v367_v9  ;;  %994 = vmatprep.mubr.msk.f32.mxu1 %vm1206_vm0, %v1205_v0  ;;  %v637_v9 = vld [vmem:[#allocation5 + $0x368] sm:$0xff] }
 0x121   :  { %964 = vmatprep.subr.mxu1 %v1205_v0 }
 0x122   :  { %965 = vmatpush3.msra.mxu1 %v366_v10  ;;  %v636_v10 = vld [vmem:[#allocation5 + $0x360] sm:$0xff] }
 0x123   :  { %966 = vmatprep.subr.mxu1 %v1205_v0 }
 0x124   :  { %967 = vmatpush3.msra.mxu1 %v365_v11  ;;  %v635_v11 = vld [vmem:[#allocation5 + $0x358] sm:$0xff] }
 0x125   :  { %968 = vmatprep.subr.mxu1 %v1205_v0 }
 0x126   :  { %969 = vmatpush3.msra.mxu1 %v364_v12  ;;  %v634_v12 = vld [vmem:[#allocation5 + $0x350] sm:$0xff] }
 0x127   :  { %970 = vmatprep.subr.mxu1 %v1205_v0 }
 0x128   :  { %971 = vmatpush3.msra.mxu1 %v363_v13  ;;  %v633_v13 = vld [vmem:[#allocation5 + $0x348] sm:$0xff] }
 0x129   :  { %972 = vmatprep.subr.mxu1 %v1205_v0 }
 0x12a   :  { %973 = vmatpush3.msra.mxu1 %v362_v14  ;;  %v632_v14 = vld [vmem:[#allocation5 + $0x340] sm:$0xff] }
 0x12b   :  { %974 = vmatprep.subr.mxu1 %v1205_v0 }
 0x12c   :  { %975 = vmatpush3.msra.mxu1 %v361_v15  ;;  %v631_v15 = vld [vmem:[#allocation5 + $0x338] sm:$0xff] }
 0x12d   :  { %976 = vmatprep.subr.mxu1 %v1205_v0 }
 0x12e   :  { %977 = vmatpush3.msra.mxu1 %v360_v16  ;;  %v630_v16 = vld [vmem:[#allocation5 + $0x330] sm:$0xff] }
 0x12f   :  { %978 = vmatprep.subr.mxu1 %v1205_v0 }
 0x130   :  { %979 = vmatpush3.msra.mxu1 %v359_v17  ;;  %v629_v17 = vld [vmem:[#allocation5 + $0x328] sm:$0xff] }
 0x131   :  { %980 = vmatprep.subr.mxu1 %v1205_v0 }
 0x132   :  { %981 = vmatpush3.msra.mxu1 %v358_v18  ;;  %v628_v18 = vld [vmem:[#allocation5 + $0x320] sm:$0xff] }
 0x133   :  { %982 = vmatprep.subr.mxu1 %v1205_v0 }
 0x134   :  { %983 = vmatpush3.msra.mxu1 %v357_v19  ;;  %v627_v19 = vld [vmem:[#allocation5 + $0x318] sm:$0xff] }
 0x135   :  { %984 = vmatprep.subr.mxu1 %v1205_v0 }
 0x136   :  { %985 = vmatpush3.msra.mxu1 %v356_v20  ;;  %v626_v20 = vld [vmem:[#allocation5 + $0x310] sm:$0xff] }
 0x137   :  { %986 = vmatprep.subr.mxu1 %v1205_v0 }
 0x138   :  { %987 = vmatpush3.msra.mxu1 %v355_v21  ;;  %v625_v21 = vld [vmem:[#allocation5 + $0x308] sm:$0xff] }
 0x139   :  { %988 = vmatprep.subr.mxu1 %v1205_v0 }
 0x13a   :  { %989 = vmatpush3.msra.mxu1 %v354_v22  ;;  %v624_v22 = vld [vmem:[#allocation5 + $0x300] sm:$0xff] }
 0x13b   :  { %990 = vmatprep.subr.mxu1 %v1205_v0 }
 0x13c   :  { %991 = vmatpush3.msra.mxu1 %v353_v23  ;;  %v734_v23 = vld [vmem:[#allocation7 + $0x2] ss:$0 sm:$0xff] }
 0x13d   :  { %992 = vmatprep.subr.mxu1 %v1205_v0 }
 0x13e   :  { %993 = vmatpush3.msra.mxu1 %v352_v24 }
 0x13f   :  { %995 = vmatmul.mubr.f32.vlgmr.msra.gmra.mxu1 %v1273_v50  ;;  %1032 = vmatprep.subr.mxu1 %v1205_v0  ;;  %v473_v50 = vld [vmem:[#allocation5 + $0x2e8] sm:$0xff] }
 0x140   :  { %1064 = vmatprep.mubr.msk.f32.mxu1 %vm1206_vm0, %v1205_v0  ;;  %1033 = vmatpush3.msra.mxu1 %v459_v27 }
 0x141   :  { %1034 = vmatprep.subr.mxu1 %v1205_v0 }
 0x142   :  { %1035 = vmatpush3.msra.mxu1 %v458_v28 }
 0x143   :  { %1036 = vmatprep.subr.mxu1 %v1205_v0 }
 0x144   :  { %1037 = vmatpush3.msra.mxu1 %v457_v29 }
 0x145   :  { %1038 = vmatprep.subr.mxu1 %v1205_v0 }
 0x146   :  { %1039 = vmatpush3.msra.mxu1 %v456_v30  ;;  %v736_v30 = vld [vmem:[#allocation7 + $0x4] ss:$0 sm:$0xff] }
 0x147   :  { %1040 = vmatprep.subr.mxu1 %v1205_v0 }
 0x148   :  { %1041 = vmatpush3.msra.mxu1 %v455_v31 }
 0x149   :  { %1042 = vmatprep.subr.mxu1 %v1205_v0 }
 0x14a   :  { %1043 = vmatpush3.msra.mxu1 %v454_v32 }
 0x14b   :  { %1044 = vmatprep.subr.mxu1 %v1205_v0 }
 0x14c   :  { %1045 = vmatpush3.msra.mxu1 %v453_v33 }
 0x14d   :  { %1046 = vmatprep.subr.mxu1 %v1205_v0 }
 0x14e   :  { %1047 = vmatpush3.msra.mxu1 %v452_v34 }
 0x14f   :  { %1048 = vmatprep.subr.mxu1 %v1205_v0 }
 0x150   :  { %1049 = vmatpush3.msra.mxu1 %v451_v35  ;;  %v74_v35 = vld [vmem:[#allocation2 + $0x10] sm:$0xff] }
 0x151   :  { %1050 = vmatprep.subr.mxu1 %v1205_v0 }
 0x152   :  { %1051 = vmatpush3.msra.mxu1 %v450_v36 }
 0x153   :  { %1052 = vmatprep.subr.mxu1 %v1205_v0 }
 0x154   :  { %1053 = vmatpush3.msra.mxu1 %v449_v37 }
 0x155   :  { %1054 = vmatprep.subr.mxu1 %v1205_v0 }
 0x156   :  { %1055 = vmatpush3.msra.mxu1 %v448_v38 }
 0x157   :  { %1056 = vmatprep.subr.mxu1 %v1205_v0 }
 0x158   :  { %1057 = vmatpush3.msra.mxu1 %v447_v39 }
 0x159   :  { %1058 = vmatprep.subr.mxu1 %v1205_v0 }
 0x15a   :  { %1059 = vmatpush3.msra.mxu1 %v446_v40 }
 0x15b   :  { %1060 = vmatprep.subr.mxu1 %v1205_v0 }
 0x15c   :  { %1061 = vmatpush3.msra.mxu1 %v445_v41 }
 0x15d   :  { %1062 = vmatprep.subr.mxu1 %v1205_v0 }
 0x15e   :  { %1063 = vmatpush3.msra.mxu1 %v444_v42 }
 0x1df   :  { %v254_v44 = vpop.f32.mrf.mxu1 }
 0x1e0   :  { %v255_v45 = vadd.f32 %v733_v43, %v254_v44 }
 0x1e1   :  { %v926_v46 = vpop.f32.mrf.mxu1 }
 0x1e2   :  { %v258_v47 = vmax.f32 %v255_v45, 0.0 }
 0x1e4   :  { %960 = vmatmul.mubr.f32.vlgmr.msra.gmra.mxu0 %v258_v47 }
 0x1e5   :  { %998 = vmatpush3.msra.mxu0 %v475_v48  ;;  %1029 = vmatprep.mubr.msk.f32.mxu0 %vm1206_vm0, %v1205_v0 }
 0x1e6   :  { %999 = vmatprep.subr.mxu0 %v1205_v0 }
 0x1e7   :  { %1000 = vmatpush3.msra.mxu0 %v474_v49 }
 0x1e8   :  { %1001 = vmatprep.subr.mxu0 %v1205_v0 }
 0x1e9   :  { %1002 = vmatpush3.msra.mxu0 %v473_v50 }
 0x1ea   :  { %1003 = vmatprep.subr.mxu0 %v1205_v0 }
 0x1eb   :  { %1004 = vmatpush3.msra.mxu0 %v472_v51 }
 0x1ec   :  { %1005 = vmatprep.subr.mxu0 %v1205_v0 }
 0x1ed   :  { %1006 = vmatpush3.msra.mxu0 %v471_v52 }
 0x1ee   :  { %1007 = vmatprep.subr.mxu0 %v1205_v0 }
 0x1ef   :  { %1008 = vmatpush3.msra.mxu0 %v470_v53 }
 0x1f0   :  { %1009 = vmatprep.subr.mxu0 %v1205_v0 }
 0x1f1   :  { %1010 = vmatpush3.msra.mxu0 %v469_v54 }
 0x1f2   :  { %1011 = vmatprep.subr.mxu0 %v1205_v0 }
 0x1f3   :  { %1012 = vmatpush3.msra.mxu0 %v468_v55 }
 0x1f4   :  { %1013 = vmatprep.subr.mxu0 %v1205_v0 }
 0x1f5   :  { %1014 = vmatpush3.msra.mxu0 %v467_v56 }
 0x1f6   :  { %1015 = vmatprep.subr.mxu0 %v1205_v0 }
 0x1f7   :  { %1016 = vmatpush3.msra.mxu0 %v466_v57 }
 0x1f8   :  { %1017 = vmatprep.subr.mxu0 %v1205_v0 }
 0x1f9   :  { %1018 = vmatpush3.msra.mxu0 %v465_v58 }
 0x1fa   :  { %1019 = vmatprep.subr.mxu0 %v1205_v0 }
 0x1fb   :  { %1020 = vmatpush3.msra.mxu0 %v464_v59 }
 0x1fc   :  { %1021 = vmatprep.subr.mxu0 %v1205_v0 }
 0x1fd   :  { %1022 = vmatpush3.msra.mxu0 %v463_v60 }
 0x1fe   :  { %1023 = vmatprep.subr.mxu0 %v1205_v0 }
 0x1ff   :  { %v439_v1 = vpop.f32.mrf.mxu1  ;;  %1024 = vmatpush3.msra.mxu0 %v462_v61 }
 0x200   :  { %v440_v2 = vadd.f32 %v735_v62, %v439_v1  ;;  %1025 = vmatprep.subr.mxu0 %v1205_v0 }
 0x201   :  { %v996_v4 = vpop.f32.mrf.mxu1  ;;  %1026 = vmatpush3.msra.mxu0 %v461_v63 }
 0x202   :  { %v443_v6 = vmax.f32 %v440_v2, 0.0  ;;  %1027 = vmatprep.subr.mxu0 %v1205_v0 }
 0x203   :  { %1028 = vmatpush3.msra.mxu0 %v460_v3 }
 0x204   :  { %1030 = vmatmul.mubr.f32.vlgmr.msra.gmra.mxu0 %v73_v5  ;;  %1065 = vmatmul.mubr.f32.vlgmr.msra.gmra.mxu1 %v443_v6 }
 0x205   :  { %1067 = vmatprep.subr.mxu0 %v1205_v0  ;;  %1099 = vmatprep.mubr.msk.f32.mxu0 %vm1206_vm0, %v1205_v0 }
 0x206   :  { %1068 = vmatpush3.msra.mxu0 %v639_v7 }
 0x207   :  { %1069 = vmatprep.subr.mxu0 %v1205_v0 }
 0x208   :  { %1070 = vmatpush3.msra.mxu0 %v638_v8 }
 0x209   :  { %1071 = vmatprep.subr.mxu0 %v1205_v0 }
 0x20a   :  { %1072 = vmatpush3.msra.mxu0 %v637_v9 }
 0x20b   :  { %1073 = vmatprep.subr.mxu0 %v1205_v0 }
 0x20c   :  { %1074 = vmatpush3.msra.mxu0 %v636_v10 }
 0x20d   :  { %1075 = vmatprep.subr.mxu0 %v1205_v0 }
 0x20e   :  { %1076 = vmatpush3.msra.mxu0 %v635_v11 }
 0x20f   :  { %1077 = vmatprep.subr.mxu0 %v1205_v0 }
 0x210   :  { %1078 = vmatpush3.msra.mxu0 %v634_v12 }
 0x211   :  { %1079 = vmatprep.subr.mxu0 %v1205_v0 }
 0x212   :  { %1080 = vmatpush3.msra.mxu0 %v633_v13 }
 0x213   :  { %1081 = vmatprep.subr.mxu0 %v1205_v0 }
 0x214   :  { %1082 = vmatpush3.msra.mxu0 %v632_v14 }
 0x215   :  { %1083 = vmatprep.subr.mxu0 %v1205_v0 }
 0x216   :  { %1084 = vmatpush3.msra.mxu0 %v631_v15 }
 0x217   :  { %1085 = vmatprep.subr.mxu0 %v1205_v0 }
 0x218   :  { %1086 = vmatpush3.msra.mxu0 %v630_v16 }
 0x219   :  { %1087 = vmatprep.subr.mxu0 %v1205_v0 }
 0x21a   :  { %1088 = vmatpush3.msra.mxu0 %v629_v17 }
 0x21b   :  { %1089 = vmatprep.subr.mxu0 %v1205_v0 }
 0x21c   :  { %1090 = vmatpush3.msra.mxu0 %v628_v18 }
 0x21d   :  { %1091 = vmatprep.subr.mxu0 %v1205_v0 }
 0x21e   :  { %1092 = vmatpush3.msra.mxu0 %v627_v19 }
 0x21f   :  { %1093 = vmatprep.subr.mxu0 %v1205_v0 }
 0x220   :  { %1094 = vmatpush3.msra.mxu0 %v626_v20 }
 0x221   :  { %1095 = vmatprep.subr.mxu0 %v1205_v0 }
 0x222   :  { %1096 = vmatpush3.msra.mxu0 %v625_v21 }
 0x223   :  { %1097 = vmatprep.subr.mxu0 %v1205_v0  ;;  %v737_v0 = vld [vmem:[#allocation7 + $0x5] ss:$0 sm:$0xff] }
 0x224   :  { %1098 = vmatpush3.msra.mxu0 %v624_v22 }
 0x2a4   :  { %v346_v24 = vpop.f32.mrf.mxu0 }
 0x2a5   :  { %v347_v25 = vadd.f32 %v734_v23, %v346_v24 }
 0x2a6   :  { %v961_v26 = vpop.f32.mrf.mxu0 }
 0x2a7   :  { %1112 = vtanh.f32 %v347_v25 }
 0x2b4   :  { %v1113_v27 = vpop.eup %1112 }
 0x2b5   :  { %351 = vst [vmem:[#allocation8] sm:$0xff] %v1113_v27 }
 0x2c4   :  { %v542_v28 = vpop.f32.mrf.mxu0  ;;  %v612_v29 = vpop.f32.mrf.mxu1 }
 0x2c5   :  { %v613_v31 = vadd.f32 %v612_v29, %v542_v28 }
 0x2c6   :  { %v1031_v32 = vpop.f32.mrf.mxu0  ;;  %v1066_v33 = vpop.f32.mrf.mxu1 }
 0x2c7   :  { %v621_v34 = vadd.f32 %v736_v30, %v613_v31 }
 0x2c9   :  { %v622_v36 = vmax.f32 %v621_v34, 0.0 }
 0x2cb   :  { %v623_v37 = vmul.f32 %v622_v36, %v74_v35 }
 0x2cd   :  { %1100 = vmatmul.mubr.f32.vlgmr.msra.gmra.mxu0 %v623_v37 }
 0x38d   :  { %v711_v38 = vpop.f32.mrf.mxu0 }
 0x38e   :  { %v712_v39 = vadd.f32 %v737_v0, %v711_v38 }
 0x38f   :  { %v1101_v40 = vpop.f32.mrf.mxu0 }
 0x390   :  { %715 = vst [vmem:[#allocation8 + $0x8] sm:$0xff] %v712_v39 }
 0x391   :  { %1185 = shalt.err (!%p1182_p5)
}
 0x392   :  { %725 = dma.vmem_to_hbm [thread:$0]  %s723_s2, 256, %s1373_s3, [#allocation4]  }
 0x393   :  { %1198 = dma.done.wait [#allocation4], 256  }
 0x394   :  { %1199 = vsyncadd [#allocation4], 4294967040 }
 0x395   :  { %729 = vsyncpa [#allocation3], 1 }
 0x396   :  { %730 = vsyncpa [#allocation6], 1 }
 0x397   :  { %731 = vsyncpa [#allocation4], 1 }

</bundles_post_ra>
